<compile_context>
chip_gen: v7x
topology: tpu7x:2x2x1
jax: 0.10.0
libtpu: 0.0.40
codegen_flags: <defaults>
</compile_context>

<pallas_src>
import numpy as np
import jax
import jax.numpy as jnp
from jax.experimental import pallas as pl
from jax.experimental.pallas import tpu as pltpu


# -----------------------------------------------------------------------------
# Pallas kernel: fused 1x1-conv MLP head + per-channel post-processing
# -----------------------------------------------------------------------------
def _predict_head_kernel(x_ref, w1_ref, b1_ref,
                         w2c_ref, b2c_ref, w2o_ref, b2o_ref, w2k_ref, b2k_ref,
                         offmask_ref,
                         conf_ref, off_ref, cls_ref):
    # x: (Cin, Tn) f32 -> bf16 MXU operand, f32 accumulate.
    x = x_ref[...].astype(jnp.bfloat16)
    # Conv2d(in_dim, hidden_dim, 1):  h = W1 @ x + b1            (hd, Tn)
    h = jnp.dot(w1_ref[...], x, preferred_element_type=jnp.float32) + b1_ref[...]
    # nn.Dropout(drop_ratio): identity at inference (eval-mode semantics).
    # TODO(synk): training-mode dropout (random mask + 1/(1-p) scaling) not implemented.
    # nn.LeakyReLU(), default negative_slope = 0.01 (f32 on the VPU).
    h = jnp.where(h > 0, h, 0.01 * h)
    hb = h.astype(jnp.bfloat16)

    # Conv2d(hidden_dim, 5A + C, 1) split into three exactly-sized row groups
    # (conf / offsets / class) so every output slab is stored unpadded and
    # never sliced in the wrapper.  Tiny-M/K matmuls are fine: mem-bound.
    y_conf = jnp.dot(w2c_ref[...], hb, preferred_element_type=jnp.float32) + b2c_ref[...]
    y_off = jnp.dot(w2o_ref[...], hb, preferred_element_type=jnp.float32) + b2o_ref[...]
    y_cls = jnp.dot(w2k_ref[...], hb, preferred_element_type=jnp.float32) + b2k_ref[...]

    # sigmoid(y) = 0.5*tanh(0.5*y) + 0.5  -> one EUP pass (vs exp + reciprocal).
    # tanh is bounded, so garbage lanes of a ragged last spatial tile stay
    # finite; Pallas masks their writeback anyway.  Post-processing is purely
    # lane-wise -- keep it that way (no cross-lane reductions on ragged tiles).
    conf_ref[...] = (0.5 * jnp.tanh(0.5 * y_conf) + 0.5).astype(conf_ref.dtype)

    # offsets rows are a*4+j: j in {0,1} (center) -> sigmoid-0.5 = 0.5*tanh(0.5*y),
    # j in {2,3} (size) -> identity.  offmask is a trace-time-constant (4A,1) blend.
    t_off = 0.5 * jnp.tanh(0.5 * y_off)
    m = offmask_ref[...]
    off_ref[...] = (y_off + m * (t_off - y_off)).astype(off_ref.dtype)

    # class logits: no transcendental at all.
    cls_ref[...] = y_cls.astype(cls_ref.dtype)


def _vmem_limit_bytes():
    """Generation-aware scoped-VMEM limit: stay well under the physical
    capacity (v5e/v6e: 128 MiB, v7x: 64 MiB per TensorCore)."""
    cap = 64 * 1024 * 1024
    try:
        cap = int(getattr(pltpu.get_tpu_info(), "vmem_capacity_bytes", cap))
    except Exception:
        pass
    return max(32 * 1024 * 1024, min(cap - 16 * 1024 * 1024, 112 * 1024 * 1024))


def _pick_tile_n(hw, batch, cin, hd, cout, vmem_limit, max_tile=16384):
    """Spatial (lane) tile size:
       * big enough to amortize the ~0.35 us per-grid-step overhead,
       * small enough that the double-buffered in/out tiles PLUS the f32/bf16
         intermediates (h, y, tanh temps) fit inside half the scoped VMEM
         limit for this TPU generation,
       * best-effort even total step count so v7x's 2 TCs split evenly."""
    per_col = (2 * 4 * (cin + cout)      # double-buffered f32 in/out tiles
               + 4 * (hd + 2 * cout)     # h, y, tanh/blend temps (f32)
               + 2 * (hd + cin))         # bf16 MXU-operand copies
    budget = vmem_limit // 2
    cap = max(128, min(max_tile, (budget // per_col) // 128 * 128))

    if hw <= cap:
        if batch % 2 == 0 or hw < 256:
            return hw                    # full-dim tile is always legal
        # Odd batch: split the spatial axis so batch * n_tiles is even.
        return min(cap, pl.cdiv(pl.cdiv(hw, 2), 128) * 128)

    n = pl.cdiv(hw, cap)
    if (batch * n) % 2 == 1:
        n += 1
    return max(128, min(cap, pl.cdiv(pl.cdiv(hw, n), 128) * 128))


def predict_head_pallas(x_cm, params, out_dtype=jnp.float32):
    """x_cm: (B, Cin, HW) f32.
    Returns (conf (B,A,HW), offsets (B,4A,HW), class (B,C,HW)) -- exact sizes,
    post-processed (sigmoid / sigmoid-0.5 / identity) per channel."""
    (w1, b1, w2c, b2c, w2o, b2o, w2k, b2k, offmask) = params
    B, cin, hw = x_cm.shape
    hd = w1.shape[0]
    A = w2c.shape[0]
    C = w2k.shape[0]
    cout = 5 * A + C

    vmem_limit = _vmem_limit_bytes()
    tile_n = _pick_tile_n(hw, B, cin, hd, cout, vmem_limit)
    grid = (B, pl.cdiv(hw, tile_n))      # ragged last tile handled by Pallas

    def inv(shape):                      # grid-invariant (tiny) parameter block
        return pl.BlockSpec(shape, lambda b, j, _s=shape: (0,) * len(_s))

    return pl.pallas_call(
        _predict_head_kernel,
        out_shape=(
            jax.ShapeDtypeStruct((B, A, hw), out_dtype),
            jax.ShapeDtypeStruct((B, 4 * A, hw), out_dtype),
            jax.ShapeDtypeStruct((B, C, hw), out_dtype),
        ),
        grid_spec=pltpu.PrefetchScalarGridSpec(
            num_scalar_prefetch=0,
            grid=grid,
            in_specs=[
                pl.BlockSpec((None, cin, tile_n), lambda b, j: (b, 0, j)),
                inv((hd, cin)),      # W1   (bf16)
                inv((hd, 1)),        # b1   (f32)
                inv((A, hd)),        # W2 conf rows (bf16)
                inv((A, 1)),         # b2 conf
                inv((4 * A, hd)),    # W2 offset rows (bf16)
                inv((4 * A, 1)),     # b2 offsets
                inv((C, hd)),        # W2 class rows (bf16)
                inv((C, 1)),         # b2 class
                inv((4 * A, 1)),     # offset sigmoid blend mask
            ],
            out_specs=[
                pl.BlockSpec((None, A, tile_n), lambda b, j: (b, 0, j)),
                pl.BlockSpec((None, 4 * A, tile_n), lambda b, j: (b, 0, j)),
                pl.BlockSpec((None, C, tile_n), lambda b, j: (b, 0, j)),
            ],
        ),
        compiler_params=pltpu.CompilerParams(
            dimension_semantics=("parallel", "parallel"),
            vmem_limit_bytes=vmem_limit),
    )(x_cm, w1, b1, w2c, b2c, w2o, b2o, w2k, b2k, offmask)


# -----------------------------------------------------------------------------
# Module wrapper (parameter setup + PyTorch-layout glue)
# -----------------------------------------------------------------------------
class PredictionNetworkPallas:
    def __init__(self, in_dim, hidden_dim=128, num_anchors=9, num_classes=20,
                 drop_ratio=0.3, out_dtype=jnp.float32, key=jax.random.PRNGKey(0)):
        assert num_classes != 0 and num_anchors != 0
        self.num_classes = num_classes
        self.num_anchors = num_anchors
        self.out_dtype = out_dtype
        A, C = num_anchors, num_classes
        cout = 5 * A + C

        k1, k2, k3, k4 = jax.random.split(key, 4)
        # torch Conv2d weight is (out, in, 1, 1); channel-major y = W @ x uses
        # exactly that (out, in) matrix -> no transposition needed.
        w1 = jax.random.normal(k1, (hidden_dim, in_dim), jnp.float32) / jnp.sqrt(in_dim)
        b1 = jax.random.normal(k2, (hidden_dim,), jnp.float32) * 0.01
        w2 = jax.random.normal(k3, (cout, hidden_dim), jnp.float32) / jnp.sqrt(hidden_dim)
        b2 = jax.random.normal(k4, (cout,), jnp.float32) * 0.01
        # Exact f32 copies in torch row order (5a+k, then classes) for reference.
        self.w1_f32, self.b1_f32, self.w2_f32, self.b2_f32 = w1, b1, w2, b2

        # Kernel-side parameters.  The second conv's rows are re-grouped into
        # three exactly-sized slabs (conf / offsets / class): channels live on
        # sublanes, so NO 128-padding is needed (full-dim blocks are legal even
        # for non-multiple-of-8 row counts).
        conf_rows = np.arange(A) * 5                                        # k == 0
        off_rows = (np.arange(A)[:, None] * 5 + np.arange(1, 5)[None, :]).reshape(-1)
        cls_rows = 5 * A + np.arange(C)

        self.w1 = w1.astype(jnp.bfloat16)
        self.b1 = b1.reshape(hidden_dim, 1)
        self.w2c = w2[conf_rows].astype(jnp.bfloat16)
        self.b2c = b2[conf_rows].reshape(A, 1)
        self.w2o = w2[off_rows].astype(jnp.bfloat16)
        self.b2o = b2[off_rows].reshape(4 * A, 1)
        self.w2k = w2[cls_rows].astype(jnp.bfloat16)
        self.b2k = b2[cls_rows].reshape(C, 1)

        # offsets row a*4+j: j in {0,1} (center offsets) -> sigmoid-0.5,
        # j in {2,3} (size offsets) -> identity.  Trace-time-constant blend mask.
        offmask = np.tile(np.array([1.0, 1.0, 0.0, 0.0], np.float32), A)
        self.offmask = jnp.asarray(offmask).reshape(4 * A, 1)

    def _params(self):
        return (self.w1, self.b1, self.w2c, self.b2c, self.w2o, self.b2o,
                self.w2k, self.b2k, self.offmask)

    def __call__(self, features, pos_anchor_idx=None, neg_anchor_idx=None):
        B, Cin, H, W = features.shape
        A, C = self.num_anchors, self.num_classes

        # NCHW -> (B, Cin, H*W): free reshape; spatial axis lands on lanes.
        x_cm = features.reshape(B, Cin, H * W)
        conf3, off3, cls3 = predict_head_pallas(x_cm, self._params(), self.out_dtype)

        # Row-major splits of contiguous dims -> free reshapes, no copies.
        conf_scores = conf3.reshape(B, A, H, W)
        offsets = off3.reshape(B, A, 4, H, W)
        class_scores = cls3.reshape(B, C, H, W)

        if pos_anchor_idx is None and neg_anchor_idx is None:
            # Inference-mode outputs (already in PyTorch's layouts).
            return conf_scores, offsets, class_scores

        # Training mode: anchor gathers (plain-JAX glue mirroring the torch
        # _extract_anchor_data / _extract_class_scores helpers).
        conf_flat = conf_scores.reshape(B * A * H * W)
        offs_flat = jnp.transpose(offsets, (0, 1, 3, 4, 2)).reshape(B * A * H * W, 4)
        conf_out = jnp.concatenate(
            [conf_flat[pos_anchor_idx], conf_flat[neg_anchor_idx]], axis=0)[:, None]
        offsets_out = offs_flat[pos_anchor_idx]                           # (M, 4)
        cls_flat = jnp.broadcast_to(
            jnp.transpose(class_scores, (0, 2, 3, 1))[:, None],
            (B, A, H, W, C)).reshape(B * A * H * W, C)
        class_out = cls_flat[pos_anchor_idx]                              # (M, C)
        return conf_out, offsets_out, class_out


# -----------------------------------------------------------------------------
# Exact f32 reference (loose numeric check of the inference path).
# Note: kernel uses bf16 MXU operands + a tanh-formulated sigmoid, so results
# are close but not bit-faithful to a pure f32 torch forward.
# -----------------------------------------------------------------------------
def _reference_forward(net, features):
    B, Cin, H, W = features.shape
    A, C = net.num_anchors, net.num_classes
    x = features.reshape(B, Cin, H * W)
    h = jnp.einsum('oc,bcn->bon', net.w1_f32, x) + net.b1_f32[None, :, None]
    h = jnp.where(h > 0, h, 0.01 * h)
    y = jnp.einsum('oc,bcn->bon', net.w2_f32, h) + net.b2_f32[None, :, None]
    co = y[:, :5 * A].reshape(B, A, 5, H, W)
    cls = y[:, 5 * A:].reshape(B, C, H, W)
    conf = jax.nn.sigmoid(co[:, :, 0])
    ctr = jax.nn.sigmoid(co[:, :, 1:3]) - 0.5
    offsets = jnp.concatenate([ctr, co[:, :, 3:5]], axis=2)
    return conf, offsets, cls


if __name__ == "__main__":
    B, in_dim, H, W = 2, 4, 16, 16
    hidden_dim, num_anchors, num_classes = 32, 9, 20

    key = jax.random.PRNGKey(0)
    k_feat, k_params, k_idx = jax.random.split(key, 3)

    features = jax.random.normal(k_feat, (B, in_dim, H, W), jnp.float32)
    net = PredictionNetworkPallas(in_dim, hidden_dim=hidden_dim,
                                  num_anchors=num_anchors,
                                  num_classes=num_classes, key=k_params)

    # Inference mode
    conf, offs, cls = net(features)
    jax.block_until_ready((conf, offs, cls))
    assert conf.shape == (B, num_anchors, H, W)
    assert offs.shape == (B, num_anchors, 4, H, W)
    assert cls.shape == (B, num_classes, H, W)

    # Loose numeric check vs exact f32 reference (bf16 MXU operands introduce
    # small, bounded differences; tanh-sigmoid itself is accurate).
    conf_r, offs_r, cls_r = _reference_forward(net, features)
    assert float(jnp.max(jnp.abs(conf - conf_r))) < 1e-1
    assert float(jnp.max(jnp.abs(offs - offs_r))) < 1e-1
    assert float(jnp.max(jnp.abs(cls - cls_r))) < 1e-1

    # Training mode (anchor extraction)
    M = 5
    total = B * num_anchors * H * W
    pos_idx = jax.random.randint(k_idx, (M,), 0, total, dtype=jnp.int32)
    neg_idx = (pos_idx + 7) % total
    conf_t, offs_t, cls_t = net(features, pos_idx, neg_idx)
    jax.block_until_ready((conf_t, offs_t, cls_t))
    assert conf_t.shape == (2 * M, 1)
    assert offs_t.shape == (M, 4)
    assert cls_t.shape == (M, num_classes)

    print("KERNEL_OK")
</pallas_src>

<mosaic_0001>
module attributes {stable_mosaic.version = 11 : i64} {
  func.func @_predict_head_kernel(%arg0: i32, %arg1: i32, %arg2: memref<1x4x256xf32, #tpu.memory_space<vmem>>, %arg3: memref<32x4xbf16, #tpu.memory_space<vmem>>, %arg4: memref<32x1xf32, #tpu.memory_space<vmem>>, %arg5: memref<9x32xbf16, #tpu.memory_space<vmem>>, %arg6: memref<9x1xf32, #tpu.memory_space<vmem>>, %arg7: memref<36x32xbf16, #tpu.memory_space<vmem>>, %arg8: memref<36x1xf32, #tpu.memory_space<vmem>>, %arg9: memref<20x32xbf16, #tpu.memory_space<vmem>>, %arg10: memref<20x1xf32, #tpu.memory_space<vmem>>, %arg11: memref<36x1xf32, #tpu.memory_space<vmem>>, %arg12: memref<1x9x256xf32, #tpu.memory_space<vmem>>, %arg13: memref<1x36x256xf32, #tpu.memory_space<vmem>>, %arg14: memref<1x20x256xf32, #tpu.memory_space<vmem>>) attributes {dimension_semantics = [#tpu.dimension_semantics<parallel>, #tpu.dimension_semantics<parallel>], iteration_bounds = array<i64: 2, 1>, scalar_prefetch = 0 : i64, scratch_operands = 0 : i64, tpu.core_type = #tpu.core_type<tc>, window_params = [{transform_indices = @transform_0, window_bounds = array<i64: 1, 4, 256>}, {pipeline_mode = #tpu.pipeline_mode<synchronous>, transform_indices = @transform_1, window_bounds = array<i64: 32, 4>}, {pipeline_mode = #tpu.pipeline_mode<synchronous>, transform_indices = @transform_2, window_bounds = array<i64: 32, 1>}, {pipeline_mode = #tpu.pipeline_mode<synchronous>, transform_indices = @transform_3, window_bounds = array<i64: 9, 32>}, {pipeline_mode = #tpu.pipeline_mode<synchronous>, transform_indices = @transform_4, window_bounds = array<i64: 9, 1>}, {pipeline_mode = #tpu.pipeline_mode<synchronous>, transform_indices = @transform_5, window_bounds = array<i64: 36, 32>}, {pipeline_mode = #tpu.pipeline_mode<synchronous>, transform_indices = @transform_6, window_bounds = array<i64: 36, 1>}, {pipeline_mode = #tpu.pipeline_mode<synchronous>, transform_indices = @transform_7, window_bounds = array<i64: 20, 32>}, {pipeline_mode = #tpu.pipeline_mode<synchronous>, transform_indices = @transform_8, window_bounds = array<i64: 20, 1>}, {pipeline_mode = #tpu.pipeline_mode<synchronous>, transform_indices = @transform_9, window_bounds = array<i64: 36, 1>}, {transform_indices = @transform_10, window_bounds = array<i64: 1, 9, 256>}, {transform_indices = @transform_11, window_bounds = array<i64: 1, 36, 256>}, {transform_indices = @transform_12, window_bounds = array<i64: 1, 20, 256>}]} {
    %c0 = arith.constant 0 : index
    %c0_0 = arith.constant 0 : index
    %c0_1 = arith.constant 0 : index
    %0 = vector.load %arg2[%c0, %c0_0, %c0_1] : memref<1x4x256xf32, #tpu.memory_space<vmem>>, vector<1x4x256xf32>
    %1 = vector.shape_cast %0 : vector<1x4x256xf32> to vector<4x256xf32>
    %2 = arith.truncf %1 : vector<4x256xf32> to vector<4x256xbf16>
    %c0_2 = arith.constant 0 : index
    %c0_3 = arith.constant 0 : index
    %3 = vector.load %arg3[%c0_2, %c0_3] : memref<32x4xbf16, #tpu.memory_space<vmem>>, vector<32x4xbf16>
    %cst = arith.constant dense<0.000000e+00> : vector<32x256xf32>
    %4 = tpu.matmul %3, %2, %cst {dimension_numbers = #tpu.dot_dimension_numbers<[1], [0], [0], [1], [0, 0, 1, 1], [], []>} : vector<32x4xbf16>, vector<4x256xbf16>, vector<32x256xf32> -> vector<32x256xf32>
    %c0_4 = arith.constant 0 : index
    %c0_5 = arith.constant 0 : index
    %5 = vector.load %arg4[%c0_4, %c0_5] : memref<32x1xf32, #tpu.memory_space<vmem>>, vector<32x1xf32>
    %6 = vector.broadcast %5 : vector<32x1xf32> to vector<32x256xf32>
    %7 = arith.addf %4, %6 : vector<32x256xf32>
    %cst_6 = arith.constant 0.000000e+00 : f32
    %8 = vector.broadcast %cst_6 : f32 to vector<32x256xf32>
    %9 = arith.cmpf ogt, %7, %8 : vector<32x256xf32>
    %cst_7 = arith.constant 0.00999999977 : f32
    %10 = vector.broadcast %cst_7 : f32 to vector<32x256xf32>
    %11 = arith.mulf %10, %7 : vector<32x256xf32>
    %12 = arith.select %9, %7, %11 : vector<32x256xi1>, vector<32x256xf32>
    %13 = arith.truncf %12 : vector<32x256xf32> to vector<32x256xbf16>
    %c0_8 = arith.constant 0 : index
    %c0_9 = arith.constant 0 : index
    %14 = vector.load %arg5[%c0_8, %c0_9] : memref<9x32xbf16, #tpu.memory_space<vmem>>, vector<9x32xbf16>
    %cst_10 = arith.constant dense<0.000000e+00> : vector<9x256xf32>
    %15 = tpu.matmul %14, %13, %cst_10 {dimension_numbers = #tpu.dot_dimension_numbers<[1], [0], [0], [1], [0, 0, 1, 1], [], []>} : vector<9x32xbf16>, vector<32x256xbf16>, vector<9x256xf32> -> vector<9x256xf32>
    %c0_11 = arith.constant 0 : index
    %c0_12 = arith.constant 0 : index
    %16 = vector.load %arg6[%c0_11, %c0_12] : memref<9x1xf32, #tpu.memory_space<vmem>>, vector<9x1xf32>
    %17 = vector.broadcast %16 : vector<9x1xf32> to vector<9x256xf32>
    %18 = arith.addf %15, %17 : vector<9x256xf32>
    %c0_13 = arith.constant 0 : index
    %c0_14 = arith.constant 0 : index
    %19 = vector.load %arg7[%c0_13, %c0_14] : memref<36x32xbf16, #tpu.memory_space<vmem>>, vector<36x32xbf16>
    %cst_15 = arith.constant dense<0.000000e+00> : vector<36x256xf32>
    %20 = tpu.matmul %19, %13, %cst_15 {dimension_numbers = #tpu.dot_dimension_numbers<[1], [0], [0], [1], [0, 0, 1, 1], [], []>} : vector<36x32xbf16>, vector<32x256xbf16>, vector<36x256xf32> -> vector<36x256xf32>
    %c0_16 = arith.constant 0 : index
    %c0_17 = arith.constant 0 : index
    %21 = vector.load %arg8[%c0_16, %c0_17] : memref<36x1xf32, #tpu.memory_space<vmem>>, vector<36x1xf32>
    %22 = vector.broadcast %21 : vector<36x1xf32> to vector<36x256xf32>
    %23 = arith.addf %20, %22 : vector<36x256xf32>
    %c0_18 = arith.constant 0 : index
    %c0_19 = arith.constant 0 : index
    %24 = vector.load %arg9[%c0_18, %c0_19] : memref<20x32xbf16, #tpu.memory_space<vmem>>, vector<20x32xbf16>
    %cst_20 = arith.constant dense<0.000000e+00> : vector<20x256xf32>
    %25 = tpu.matmul %24, %13, %cst_20 {dimension_numbers = #tpu.dot_dimension_numbers<[1], [0], [0], [1], [0, 0, 1, 1], [], []>} : vector<20x32xbf16>, vector<32x256xbf16>, vector<20x256xf32> -> vector<20x256xf32>
    %c0_21 = arith.constant 0 : index
    %c0_22 = arith.constant 0 : index
    %26 = vector.load %arg10[%c0_21, %c0_22] : memref<20x1xf32, #tpu.memory_space<vmem>>, vector<20x1xf32>
    %27 = vector.broadcast %26 : vector<20x1xf32> to vector<20x256xf32>
    %28 = arith.addf %25, %27 : vector<20x256xf32>
    %cst_23 = arith.constant 5.000000e-01 : f32
    %29 = vector.broadcast %cst_23 : f32 to vector<9x256xf32>
    %30 = arith.mulf %29, %18 : vector<9x256xf32>
    %31 = math.tanh %30 : vector<9x256xf32>
    %cst_24 = arith.constant 5.000000e-01 : f32
    %32 = vector.broadcast %cst_24 : f32 to vector<9x256xf32>
    %33 = arith.mulf %32, %31 : vector<9x256xf32>
    %cst_25 = arith.constant 5.000000e-01 : f32
    %34 = vector.broadcast %cst_25 : f32 to vector<9x256xf32>
    %35 = arith.addf %33, %34 : vector<9x256xf32>
    %c0_26 = arith.constant 0 : index
    %c0_27 = arith.constant 0 : index
    %c0_28 = arith.constant 0 : index
    %36 = vector.load %arg12[%c0_26, %c0_27, %c0_28] : memref<1x9x256xf32, #tpu.memory_space<vmem>>, vector<1x9x256xf32>
    %37 = vector.shape_cast %36 : vector<1x9x256xf32> to vector<9x256xf32>
    %38 = vector.shape_cast %35 : vector<9x256xf32> to vector<1x9x256xf32>
    tpu.vector_store %arg12[%c0_26, %c0_27, %c0_28], %38 {strides = array<i32>} : memref<1x9x256xf32, #tpu.memory_space<vmem>>, vector<1x9x256xf32>,
    %cst_29 = arith.constant 5.000000e-01 : f32
    %39 = vector.broadcast %cst_29 : f32 to vector<36x256xf32>
    %40 = arith.mulf %39, %23 : vector<36x256xf32>
    %41 = math.tanh %40 : vector<36x256xf32>
    %cst_30 = arith.constant 5.000000e-01 : f32
    %42 = vector.broadcast %cst_30 : f32 to vector<36x256xf32>
    %43 = arith.mulf %42, %41 : vector<36x256xf32>
    %c0_31 = arith.constant 0 : index
    %c0_32 = arith.constant 0 : index
    %44 = vector.load %arg11[%c0_31, %c0_32] : memref<36x1xf32, #tpu.memory_space<vmem>>, vector<36x1xf32>
    %45 = arith.subf %43, %23 : vector<36x256xf32>
    %46 = vector.broadcast %44 : vector<36x1xf32> to vector<36x256xf32>
    %47 = arith.mulf %46, %45 : vector<36x256xf32>
    %48 = arith.addf %23, %47 : vector<36x256xf32>
    %c0_33 = arith.constant 0 : index
    %c0_34 = arith.constant 0 : index
    %c0_35 = arith.constant 0 : index
    %49 = vector.load %arg13[%c0_33, %c0_34, %c0_35] : memref<1x36x256xf32, #tpu.memory_space<vmem>>, vector<1x36x256xf32>
    %50 = vector.shape_cast %49 : vector<1x36x256xf32> to vector<36x256xf32>
    %51 = vector.shape_cast %48 : vector<36x256xf32> to vector<1x36x256xf32>
    tpu.vector_store %arg13[%c0_33, %c0_34, %c0_35], %51 {strides = array<i32>} : memref<1x36x256xf32, #tpu.memory_space<vmem>>, vector<1x36x256xf32>,
    %c0_36 = arith.constant 0 : index
    %c0_37 = arith.constant 0 : index
    %c0_38 = arith.constant 0 : index
    %52 = vector.load %arg14[%c0_36, %c0_37, %c0_38] : memref<1x20x256xf32, #tpu.memory_space<vmem>>, vector<1x20x256xf32>
    %53 = vector.shape_cast %52 : vector<1x20x256xf32> to vector<20x256xf32>
    %54 = vector.shape_cast %28 : vector<20x256xf32> to vector<1x20x256xf32>
    tpu.vector_store %arg14[%c0_36, %c0_37, %c0_38], %54 {strides = array<i32>} : memref<1x20x256xf32, #tpu.memory_space<vmem>>, vector<1x20x256xf32>,
    return
  }
  func.func @transform_0(%arg0: i32, %arg1: i32) -> (i32, i32, i32) {
    %c0_i32 = arith.constant 0 : i32
    %c0_i32_0 = arith.constant 0 : i32
    return %arg0, %c0_i32, %arg1 : i32, i32, i32
  }
  func.func @transform_1(%arg0: i32, %arg1: i32) -> (i32, i32) {
    %c0_i32 = arith.constant 0 : i32
    %c0_i32_0 = arith.constant 0 : i32
    %c0_i32_1 = arith.constant 0 : i32
    return %c0_i32, %c0_i32_0 : i32, i32
  }
  func.func @transform_2(%arg0: i32, %arg1: i32) -> (i32, i32) {
    %c0_i32 = arith.constant 0 : i32
    %c0_i32_0 = arith.constant 0 : i32
    %c0_i32_1 = arith.constant 0 : i32
    return %c0_i32, %c0_i32_0 : i32, i32
  }
  func.func @transform_3(%arg0: i32, %arg1: i32) -> (i32, i32) {
    %c0_i32 = arith.constant 0 : i32
    %c0_i32_0 = arith.constant 0 : i32
    %c0_i32_1 = arith.constant 0 : i32
    return %c0_i32, %c0_i32_0 : i32, i32
  }
  func.func @transform_4(%arg0: i32, %arg1: i32) -> (i32, i32) {
    %c0_i32 = arith.constant 0 : i32
    %c0_i32_0 = arith.constant 0 : i32
    %c0_i32_1 = arith.constant 0 : i32
    return %c0_i32, %c0_i32_0 : i32, i32
  }
  func.func @transform_5(%arg0: i32, %arg1: i32) -> (i32, i32) {
    %c0_i32 = arith.constant 0 : i32
    %c0_i32_0 = arith.constant 0 : i32
    %c0_i32_1 = arith.constant 0 : i32
    return %c0_i32, %c0_i32_0 : i32, i32
  }
  func.func @transform_6(%arg0: i32, %arg1: i32) -> (i32, i32) {
    %c0_i32 = arith.constant 0 : i32
    %c0_i32_0 = arith.constant 0 : i32
    %c0_i32_1 = arith.constant 0 : i32
    return %c0_i32, %c0_i32_0 : i32, i32
  }
  func.func @transform_7(%arg0: i32, %arg1: i32) -> (i32, i32) {
    %c0_i32 = arith.constant 0 : i32
    %c0_i32_0 = arith.constant 0 : i32
    %c0_i32_1 = arith.constant 0 : i32
    return %c0_i32, %c0_i32_0 : i32, i32
  }
  func.func @transform_8(%arg0: i32, %arg1: i32) -> (i32, i32) {
    %c0_i32 = arith.constant 0 : i32
    %c0_i32_0 = arith.constant 0 : i32
    %c0_i32_1 = arith.constant 0 : i32
    return %c0_i32, %c0_i32_0 : i32, i32
  }
  func.func @transform_9(%arg0: i32, %arg1: i32) -> (i32, i32) {
    %c0_i32 = arith.constant 0 : i32
    %c0_i32_0 = arith.constant 0 : i32
    %c0_i32_1 = arith.constant 0 : i32
    return %c0_i32, %c0_i32_0 : i32, i32
  }
  func.func @transform_10(%arg0: i32, %arg1: i32) -> (i32, i32, i32) {
    %c0_i32 = arith.constant 0 : i32
    %c0_i32_0 = arith.constant 0 : i32
    return %arg0, %c0_i32, %arg1 : i32, i32, i32
  }
  func.func @transform_11(%arg0: i32, %arg1: i32) -> (i32, i32, i32) {
    %c0_i32 = arith.constant 0 : i32
    %c0_i32_0 = arith.constant 0 : i32
    return %arg0, %c0_i32, %arg1 : i32, i32, i32
  }
  func.func @transform_12(%arg0: i32, %arg1: i32) -> (i32, i32, i32) {
    %c0_i32 = arith.constant 0 : i32
    %c0_i32_0 = arith.constant 0 : i32
    return %arg0, %c0_i32, %arg1 : i32, i32, i32
  }
}

</mosaic_0001>

<bundles_post_ra>
// kernel: tpu_custom_call.1
= control target key start
LH: loop header
LB: loop body
LE: loop exit
PB: predicated region body
PF: predicated region fallthrough
CT: control target
= control target key end

     0   :  { %s1411_s21 = smov 0   ;;  %s1413_s22 = smov 0   ;;  %s1645_s0 = inlined_call_operand.vmem [shape: f32[2,4,256], index: 0, kind: input, shape index: {}]   ;;  %s1646_s1 = inlined_call_operand.vmem [shape: bf16[32,4], index: 1, kind: input, shape index: {}]   ;;  %s1647_s2 = inlined_call_operand.vmem [shape: f32[32,1], index: 2, kind: input, shape index: {}]   ;;  %s1648_s3 = inlined_call_operand.vmem [shape: bf16[9,32], index: 3, kind: input, shape index: {}]   ;;  %s1649_s4 = inlined_call_operand.vmem [shape: f32[9,1], index: 4, kind: input, shape index: {}]   ;;  %s1650_s5 = inlined_call_operand.vmem [shape: bf16[36,32], index: 5, kind: input, shape index: {}]   ;;  %s1651_s6 = inlined_call_operand.vmem [shape: f32[36,1], index: 6, kind: input, shape index: {}]   ;;  %s1652_s7 = inlined_call_operand.vmem [shape: bf16[20,32], index: 7, kind: input, shape index: {}]   ;;  %s1653_s8 = inlined_call_operand.vmem [shape: f32[20,1], index: 8, kind: input, shape index: {}]   ;;  %s1654_s9 = inlined_call_operand.vmem [shape: f32[36,1], index: 9, kind: input, shape index: {}]   ;;  %s1655_s10 = inlined_call_operand.vmem [shape: f32[2,9,256], index: 10, kind: output, shape index: {0}]   ;;  %s1656_s11 = inlined_call_operand.vmem [shape: f32[2,36,256], index: 11, kind: output, shape index: {1}]   ;;  %s1657_s12 = inlined_call_operand.vmem [shape: f32[2,20,256], index: 12, kind: output, shape index: {2}]  }
   0x1   :  { %s1415_s23 = smov 0  }
   0x2 LB: > { %s35_s24 = sadd.s32 1, %s1339_s22  ;;  %p1227_p0 = scmp.ge.s32.totalorder %s1343_s23, 1  ;;  %s1343_s23 = sphi %s1415_s23, %s23_s23   ;;  %s1339_s22 = sphi %s1413_s22, %s1659_s22   ;;  %s1335_s21 = sphi %s1411_s21, %s1658_s21  }
   0x3   : > { %p37_p1 = scmp.ge.s32.totalorder %s35_s24, 2  ;;  %p392_p2 = scmp.lt.s32.totalorder %s1343_s23, 3 }
   0x5   : > { %s1661_s24 = smov (%p37_p1, %s35_s24), 0  ;;  %p393_p3 = pnand %p1227_p0, %p392_p2 }
   0x6   : > { %p461_p4 = scmp.lt.s32.totalorder (!%p393_p3), %s1335_s21, 1  ;;  %v1345_v0 = vmov (!%p393_p3), 0   ;;  %v511_v1 = vld [vmem:[%s1647_s2] sm:$0xff] (!%p393_p3)  ;;  %v513_v2 = vld [vmem:[%s1647_s2 + $0x10] sm:$0xff] (!%p393_p3)  ;;  %v512_v3 = vld [vmem:[%s1647_s2 + $0x8] sm:$0xff] (!%p393_p3)  ;;  %vm552_vm0 = vcmask (!%p393_p3), 1041408  }
   0x7   : > { %396 = sbr.rel (%p393_p3) target bundleno = 521 (0x209), region = 60  ;;  %591 = vmatprep.mubr.bf16.mxu0 (!%p393_p3), %v1345_v0  ;;  %1282 = vset.pattern.permute.xlu0 (!%p393_p3), %v1345_v0  ;;  %v514_v4 = vld [vmem:[%s1647_s2 + $0x18] sm:$0xff] (!%p393_p3)  ;;  %v711_v8 = vld [vmem:[%s1651_s6] sm:$0xff] (!%p393_p3)  ;;  %v712_v12 = vld [vmem:[%s1651_s6 + $0x8] sm:$0xff] (!%p393_p3)  ;;  %vm545_vm1 = vcmask (!%p393_p3), 31744   ;;  %vm659_vm10 = vcmask (!%p393_p3), 261120  }
   0x8   : > { %1283 = vset.pattern.permute.xlu1 (!%p393_p3), %v1345_v0  ;;  %695 = vmatprep.mubr.bf16.mxu1 (!%p393_p3), %v1345_v0  ;;  %v1285_v11 = vld [vmem:[%s1646_s1] sm:$0xff] (!%p393_p3)   ;;  %v713_v13 = vld [vmem:[%s1651_s6 + $0x10] sm:$0xff] (!%p393_p3)  ;;  %v714_v14 = vld [vmem:[%s1651_s6 + $0x18] sm:$0xff] (!%p393_p3) }
   0x9   : > { %517 = vperm.xlu0 (!%p393_p3), %1282, %v511_v1   ;;  %527 = vperm.xlu1 (!%p393_p3), %1283, %v513_v2   ;;  %v715_v15 = vld [vmem:[%s1651_s6 + $0x20] sm:$0xf] (!%p393_p3)  ;;  %v1286_v17 = vld [vmem:[%s1646_s1 + $0x8] sm:$0xff] (!%p393_p3)   ;;  %v962_v21 = vld [vmem:[%s1654_s9 + $0x10] sm:$0xff] (!%p393_p3) }
   0xa   : > { %v642_v16 = vld [vmem:[%s1649_s4] sm:$0xff] (!%p393_p3)  ;;  %v643_v18 = vld [vmem:[%s1649_s4 + $0x8] sm:$0x1] (!%p393_p3)  ;;  %v963_v22 = vld [vmem:[%s1654_s9 + $0x18] sm:$0xff] (!%p393_p3) }
   0xb   : > { %v960_v19 = vld [vmem:[%s1654_s9] sm:$0xff] (!%p393_p3)  ;;  %v961_v20 = vld [vmem:[%s1654_s9 + $0x8] sm:$0xff] (!%p393_p3)  ;;  %v829_v26 = vld [vmem:[%s1653_s8 + $0x10] sm:$0xf] (!%p393_p3) }
   0xc   : > { %v964_v23 = vld [vmem:[%s1654_s9 + $0x20] sm:$0xf] (!%p393_p3)  ;;  %v828_v25 = vld [vmem:[%s1653_s8 + $0x8] sm:$0xff] (!%p393_p3) }
   0xd   : > { %522 = vperm.xlu0 (!%p393_p3), %1282, %v512_v3   ;;  %532 = vperm.xlu1 (!%p393_p3), %1283, %v514_v4   ;;  %v827_v24 = vld [vmem:[%s1653_s8] sm:$0xff] (!%p393_p3) }
   0xe   : > { %s1663_s21 = smov (!%p461_p4, %s1335_s21), 1  ;;  %v1287_v4 = vld [vmem:[%s1648_s3] sm:$0x1f]  }
   0xf   : > { %s1253_s29 = sshll.u32 %s1663_s21, 3  ;;  %s1256_s27 = smul.u32 48, %s1663_s21 }
  0x10   : > { %s468_s16 = scalar_lea.vmem %s1645_s0, %s1253_s29  ;;  %s1254_s13 = sshll.u32 %s1663_s21, 5 }
  0x11   : > { %v501_v5 = vld [vmem:[%s468_s16] sm:$0xff]  ;;  %718 = vperm.xlu0 %1282, %v711_v8   ;;  %723 = vperm.xlu1 %1283, %v712_v12   ;;  %v1291_v8 = vld [vmem:[%s1650_s5 + $0x8] sm:$0xff]   ;;  %s1552_s30 = scalar_lea.vmem %s1657_s12, %s1256_s27  ;;  %s478_s16 = scalar_lea.vmem %s1655_s10, %s1254_s13 }
  0x12   : > { %v503_v6 = vcombine.high %v501_v5, %v501_v5  ;;  %v505_v7 = vpack.c.bf16 %v501_v5, %v501_v5  ;;  %v1288_v5 = vld [vmem:[%s1652_s7] sm:$0xff]   ;;  %s1255_s17 = smul.u32 80, %s1663_s21 }
  0x14   : > { %v506_v9 = vpack.c.bf16 %v503_v6, %v503_v6  ;;  %v554_v10 = vsel %vm552_vm0, %v505_v7, 0  ;;  %v1289_v6 = vld [vmem:[%s1650_s5] sm:$0xff]   ;;  %v1290_v7 = vld [vmem:[%s1652_s7 + $0x8] ss:$0 sps:$4 sm:$0x33]   ;;  %s1602_s19 = scalar_lea.vmem %s1656_s11, %s1255_s17 }
  0x15   : > { %728 = vperm.xlu0 %1282, %v713_v13   ;;  %733 = vperm.xlu1 %1283, %v714_v14  }
  0x16   : > { %1236 = vmatprep.subr.msk.bf16.mxu0 %vm552_vm0, %v506_v9  ;;  %v1292_v9 = vld [vmem:[%s1650_s5 + $0x10] ss:$0 sps:$4 sm:$0x33]  }
  0x17   : > { %560 = vmatpush1.bf16.msra.mxu0 %v554_v10 }
  0x19   : > { %738 = vperm.xlu0 %1282, %v715_v15   ;;  %646 = vperm.xlu1 %1283, %v642_v16  }
  0x1a   : > { %1237 = vmatmul.mubr.msk.bf16.vlgmr.msra.gmra.mrb[0].mxu0 %vm545_vm1, %v1285_v11 }
  0x1b   : > { %601 = vmatprep.mubr.bf16.mxu0 %v1345_v0 }
  0x1d   : > { %651 = vperm.xlu0 %1282, %v643_v18   ;;  %977 = vperm.xlu1 %1283, %v960_v19  }
  0x21   : > { %982 = vperm.xlu0 %1282, %v961_v20   ;;  %987 = vperm.xlu1 %1283, %v962_v21  }
  0x22   : > { %1238 = vmatmul.mubr.msk.bf16.gmra.mrb[4].mxu0 %vm545_vm1, %v1286_v17 }
  0x23   : > { %891 = vmatprep.mubr.bf16.mxu0 %v1345_v0 }
  0x25   : > { %992 = vperm.xlu0 %1282, %v963_v22   ;;  %997 = vperm.xlu1 %1283, %v964_v23  }
  0x29   : > { %832 = vperm.xlu0 %1282, %v827_v24   ;;  %837 = vperm.xlu1 %1283, %v828_v25  }
  0x2d   : > { %842 = vperm.xlu0 %1282, %v829_v26  }
  0x88   : > { %v518_v27 = vpop.permute.xlu0 %517  ;;  %v528_v37 = vpop.permute.xlu1 %527 }
  0x8c   : > { %v523_v31 = vpop.permute.xlu0 %522  ;;  %v533_v51 = vpop.permute.xlu1 %532 }
  0x90   : > { %v719_v10 = vpop.permute.xlu0 %718  ;;  %v724_v11 = vpop.permute.xlu1 %723 }
  0x94   : > { %v1532_v12 = vpop.permute.xlu0 %728  ;;  %v1534_v13 = vpop.permute.xlu1 %733 }
  0x98   : > { %v1536_v14 = vpop.permute.xlu0 %738  ;;  %v647_v15 = vpop.permute.xlu1 %646 }
  0x9c   : > { %v652_v16 = vpop.permute.xlu0 %651  ;;  %v1538_v17 = vpop.permute.xlu1 %977 }
  0xa0   : > { %v1540_v18 = vpop.permute.xlu0 %982 }
  0xa4   : > { %v1544_v19 = vpop.permute.xlu0 %992 }
  0xa8   : > { %v833_v21 = vpop.permute.xlu0 %832 }
  0xed   : > { %v593_v28 = vpop.f32.mrb[0].mxu0 }
  0xee   : > { %v594_v29 = vadd.f32 %v593_v28, %v518_v27  ;;  %v595_v30 = vpop.f32.mrb[1].mxu0 }
  0xef   : > { %v596_v32 = vadd.f32 %v595_v30, %v518_v27  ;;  %v597_v33 = vpop.f32.mrb[2].mxu0 }
  0xf0   : > { %v620_v34 = vmul.f32 0.01, %v594_v29  ;;  %v598_v35 = vadd.f32 %v597_v33, %v523_v31  ;;  %v599_v36 = vpop.f32.mrb[3].mxu0  ;;  %vm612_vm2 = vcmp.gt.f32.partialorder %v594_v29, 0.0 }
  0xf1   : > { %v621_v38 = vmul.f32 0.01, %v596_v32  ;;  %v600_v39 = vadd.f32 %v599_v36, %v523_v31  ;;  %vm613_vm3 = vcmp.gt.f32.partialorder %v596_v32, 0.0 }
  0xf2   : > { %vm614_vm4 = vcmp.gt.f32.partialorder %v598_v35, 0.0  ;;  %v622_v40 = vmul.f32 0.01, %v598_v35  ;;  %v628_v42 = vsel %vm612_vm2, %v594_v29, %v620_v34 }
  0xf3   : > { %vm615_vm5 = vcmp.gt.f32.partialorder %v600_v39, 0.0  ;;  %v623_v41 = vmul.f32 0.01, %v600_v39  ;;  %v629_v45 = vsel %vm613_vm3, %v596_v32, %v621_v38 }
  0xf4   : > { %v630_v43 = vsel %vm614_vm4, %v598_v35, %v622_v40 }
  0xf5   : > { %v603_v44 = vpop.f32.mrb[4].mxu0  ;;  %v631_v46 = vsel %vm615_vm5, %v600_v39, %v623_v41  ;;  %v636_v47 = vpack.c.bf16 %v630_v43, %v628_v42  ;;  %v843_v43 = vpop.permute.xlu0 %842 }
  0xf6   : > { %v604_v48 = vadd.f32 %v603_v44, %v528_v37  ;;  %v605_v49 = vpop.f32.mrb[5].mxu0  ;;  %v637_v50 = vpack.c.bf16 %v631_v46, %v629_v45 }
  0xf7   : > { %v606_v52 = vadd.f32 %v605_v49, %v528_v37  ;;  %v607_v53 = vpop.f32.mrb[6].mxu0 }
  0xf8   : > { %v624_v54 = vmul.f32 0.01, %v604_v48  ;;  %v608_v55 = vadd.f32 %v607_v53, %v533_v51  ;;  %v609_v56 = vpop.f32.mrb[7].mxu0  ;;  %663 = vmatprep.subr.bf16.mxu1 %v637_v50  ;;  %859 = vmatprep.subr.bf16.mxu0 %v637_v50  ;;  %vm616_vm6 = vcmp.gt.f32.partialorder %v604_v48, 0.0 }
  0xf9   : > { %v625_v57 = vmul.f32 0.01, %v606_v52  ;;  %v610_v58 = vadd.f32 %v609_v56, %v533_v51  ;;  %664 = vmatpush1.bf16.msra.mxu1 %v636_v47  ;;  %860 = vmatpush1.bf16.msra.mxu0 %v636_v47  ;;  %vm617_vm7 = vcmp.gt.f32.partialorder %v606_v52, 0.0 }
  0xfa   : > { %vm618_vm8 = vcmp.gt.f32.partialorder %v608_v55, 0.0  ;;  %v626_v59 = vmul.f32 0.01, %v608_v55  ;;  %v632_v61 = vsel %vm616_vm6, %v604_v48, %v624_v54 }
  0xfb   : > { %vm619_vm9 = vcmp.gt.f32.partialorder %v610_v58, 0.0  ;;  %v627_v60 = vmul.f32 0.01, %v610_v58  ;;  %v633_v63 = vsel %vm617_vm7, %v606_v52, %v625_v57 }
  0xfc   : > { %v634_v62 = vsel %vm618_vm8, %v608_v55, %v626_v59 }
  0xfd   : > { %v635_v1 = vsel %vm619_vm9, %v610_v58, %v627_v60  ;;  %v638_v2 = vpack.c.bf16 %v634_v62, %v632_v61 }
  0xfe   : > { %v639_v3 = vpack.c.bf16 %v635_v1, %v633_v63 }
 0x100   : > { %665 = vmatprep.subr.bf16.mxu1 %v639_v3  ;;  %861 = vmatprep.subr.bf16.mxu0 %v639_v3 }
 0x101   : > { %666 = vmatpush1.bf16.msra.mxu1 %v638_v2  ;;  %862 = vmatpush1.bf16.msra.mxu0 %v638_v2 }
 0x102   : > { %763 = vmatprep.subr.bf16.mxu1 %v637_v50 }
 0x104   : > { %1240 = vmatmul.mubr.msk.bf16.vlgmr.msra.gmra.mrb[0].mxu1 %vm659_vm10, %v1287_v4  ;;  %1249 = vmatmul.mubr.msk.bf16.vlgmr.msra.gmra.mrb[8].mxu0 %vm659_vm10, %v1288_v5 }
 0x105   : > { %764 = vmatpush1.bf16.msra.mxu1 %v636_v47  ;;  %795 = vmatprep.mubr.bf16.mxu1 %v1345_v0 }
 0x106   : > { %765 = vmatprep.subr.bf16.mxu1 %v639_v3  ;;  %901 = vmatprep.mubr.bf16.mxu0 %v1345_v0 }
 0x109   : > { %766 = vmatpush1.bf16.msra.mxu1 %v638_v2 }
 0x10c   : > { %1244 = vmatmul.mubr.msk.bf16.vlgmr.msra.gmra.mrb[4].mxu1 %vm659_vm10, %v1289_v6  ;;  %1250 = vmatmul.mubr.msk.bf16.gmra.mrb[12].mxu0 %vm659_vm10, %v1290_v7 }
 0x10d   : > { %805 = vmatprep.mubr.bf16.mxu1 %v1345_v0 }
 0x114   : > { %1245 = vmatmul.mubr.msk.bf16.gmra.mrb[8].mxu1 %vm659_vm10, %v1291_v8 }
 0x115   : > { %815 = vmatprep.mubr.bf16.mxu1 %v1345_v0  ;;  %v1542_v0 = vpop.permute.xlu1 %987 }
 0x119   : > { %v1546_v20 = vpop.permute.xlu1 %997 }
 0x11c   : > { %1246 = vmatmul.mubr.msk.bf16.gmra.mrb[12].mxu1 %vm659_vm10, %v1292_v9 }
 0x11d   : > { %v838_v22 = vpop.permute.xlu1 %837 }
 0x1d7   : > { %v697_v23 = vpop.f32.mrb[0].mxu1  ;;  %v893_v24 = vpop.f32.mrb[8].mxu0 }
 0x1d8   : > { %v698_v25 = vadd.f32 %v697_v23, %v647_v15  ;;  %v894_v26 = vadd.f32 %v893_v24, %v833_v21  ;;  %v699_v27 = vpop.f32.mrb[1].mxu1  ;;  %v895_v28 = vpop.f32.mrb[9].mxu0 }
 0x1d9   : > { %v700_v29 = vadd.f32 %v699_v27, %v647_v15  ;;  %v896_v30 = vadd.f32 %v895_v28, %v833_v21  ;;  %v701_v31 = vpop.f32.mrb[2].mxu1  ;;  %v897_v32 = vpop.f32.mrb[10].mxu0 }
 0x1da   : > { %v910_v33 = vmul.f32 0.5, %v698_v25  ;;  %1030 = vst [vmem:[%s1552_s30] sm:$0xff] %v894_v26  ;;  %v702_v34 = vadd.f32 %v701_v31, %v652_v16  ;;  %v898_v35 = vadd.f32 %v897_v32, %v838_v22  ;;  %v703_v36 = vpop.f32.mrb[3].mxu1  ;;  %v899_v37 = vpop.f32.mrb[11].mxu0 }
 0x1db   : > { %v911_v38 = vmul.f32 0.5, %v700_v29  ;;  %1031 = vst [vmem:[%s1552_s30 + $0x8] sm:$0xff] %v896_v30  ;;  %v704_v39 = vadd.f32 %v703_v36, %v652_v16  ;;  %v900_v40 = vadd.f32 %v899_v37, %v838_v22 }
 0x1dc   : > { %1293 = vtanh.f32 %v910_v33  ;;  %v912_v41 = vmul.f32 0.5, %v702_v34  ;;  %1032 = vst [vmem:[%s1552_s30 + $0x10] sm:$0xff] %v898_v35 }
 0x1dd   : > { %1295 = vtanh.f32 %v911_v38  ;;  %v913_v42 = vmul.f32 0.5, %v704_v39  ;;  %1033 = vst [vmem:[%s1552_s30 + $0x18] sm:$0xff] %v900_v40 }
 0x1de   : > { %1297 = vtanh.f32 %v912_v41 }
 0x1df   : > { %1299 = vtanh.f32 %v913_v42  ;;  %v797_v44 = vpop.f32.mrb[4].mxu1  ;;  %v903_v45 = vpop.f32.mrb[12].mxu0 }
 0x1e0   : > { %v1558_v46 = vadd.f32 %v797_v44, %v719_v10  ;;  %v904_v47 = vadd.f32 %v903_v45, %v843_v43  ;;  %v799_v48 = vpop.f32.mrb[5].mxu1  ;;  %v905_v49 = vpop.f32.mrb[13].mxu0 }
 0x1e1   : > { %v1560_v50 = vadd.f32 %v799_v48, %v719_v10  ;;  %v906_v51 = vadd.f32 %v905_v49, %v843_v43  ;;  %v801_v52 = vpop.f32.mrb[6].mxu1  ;;  %v907_v53 = vpop.f32.mrb[14].mxu0 }
 0x1e2   : > { %v930_v54 = vmul.f32 0.5, %v1558_v46  ;;  %1034 = vst [vmem:[%s1552_s30 + $0x20] sm:$0xf] %v904_v47  ;;  %v1564_v55 = vadd.f32 %v801_v52, %v724_v11  ;;  %v803_v56 = vpop.f32.mrb[7].mxu1  ;;  %v908_v57 = vpop.f32.mrb[15].mxu0 }
 0x1e3   : > { %v931_v58 = vmul.f32 0.5, %v1560_v50  ;;  %1035 = vst [vmem:[%s1552_s30 + $0x28] sm:$0xf] %v906_v51  ;;  %v1568_v59 = vadd.f32 %v803_v56, %v724_v11 }
 0x1e4   : > { %1301 = vtanh.f32 %v930_v54  ;;  %v932_v60 = vmul.f32 0.5, %v1564_v55 }
 0x1e5   : > { %1303 = vtanh.f32 %v931_v58  ;;  %v933_v61 = vmul.f32 0.5, %v1568_v59 }
 0x1e6   : > { %v1294_v62 = vpop.eup %1293  ;;  %1305 = vtanh.f32 %v932_v60 }
 0x1e7   : > { %v1296_v63 = vpop.eup %1295  ;;  %v918_v1 = vmul.f32 0.5, %v1294_v62  ;;  %1307 = vtanh.f32 %v933_v61  ;;  %v807_v2 = vpop.f32.mrb[8].mxu1 }
 0x1e8   : > { %v1298_v3 = vpop.eup %1297  ;;  %v919_v4 = vmul.f32 0.5, %v1296_v63  ;;  %v1577_v5 = vadd.f32 %v807_v2, %v1532_v12  ;;  %v809_v6 = vpop.f32.mrb[9].mxu1 }
 0x1e9   : > { %v1300_v7 = vpop.eup %1299  ;;  %v922_v8 = vadd.f32 0.5, %v918_v1  ;;  %v920_v9 = vmul.f32 0.5, %v1298_v3  ;;  %v1580_v10 = vadd.f32 %v809_v6, %v1532_v12  ;;  %v811_v11 = vpop.f32.mrb[10].mxu1 }
 0x1ea   : > { %v923_v15 = vadd.f32 0.5, %v919_v4  ;;  %v921_v16 = vmul.f32 0.5, %v1300_v7  ;;  %v934_v21 = vmul.f32 0.5, %v1577_v5  ;;  %v1584_v22 = vadd.f32 %v811_v11, %v1534_v13  ;;  %v813_v23 = vpop.f32.mrb[11].mxu1 }
 0x1eb   : > { %926 = vst [vmem:[%s478_s16] sm:$0xff] %v922_v8  ;;  %v924_v24 = vadd.f32 0.5, %v920_v9  ;;  %v935_v25 = vmul.f32 0.5, %v1580_v10  ;;  %v1588_v26 = vadd.f32 %v813_v23, %v1534_v13 }
 0x1ec   : > { %927 = vst [vmem:[%s478_s16 + $0x8] sm:$0xff] %v923_v15  ;;  %v925_v12 = vadd.f32 0.5, %v921_v16  ;;  %1309 = vtanh.f32 %v934_v21  ;;  %v936_v27 = vmul.f32 0.5, %v1584_v22 }
 0x1ed   : > { %928 = vst [vmem:[%s478_s16 + $0x10] sm:$0x1] %v924_v24  ;;  %1311 = vtanh.f32 %v935_v25  ;;  %v937_v28 = vmul.f32 0.5, %v1588_v26 }
 0x1ee   : > { %v1302_v29 = vpop.eup %1301  ;;  %929 = vst [vmem:[%s478_s16 + $0x18] sm:$0x1] %v925_v12  ;;  %1313 = vtanh.f32 %v936_v27 }
 0x1ef   : > { %v1304_v30 = vpop.eup %1303  ;;  %v950_v31 = vmul.f32 0.5, %v1302_v29  ;;  %1315 = vtanh.f32 %v937_v28  ;;  %v817_v32 = vpop.f32.mrb[12].mxu1 }
 0x1f0   : > { %v1306_v33 = vpop.eup %1305  ;;  %v951_v13 = vmul.f32 0.5, %v1304_v30  ;;  %v818_v34 = vadd.f32 %v817_v32, %v1536_v14  ;;  %v819_v35 = vpop.f32.mrb[13].mxu1 }
 0x1f1   : > { %v1308_v36 = vpop.eup %1307  ;;  %v965_v37 = vsub.f32 %v950_v31, %v1558_v46  ;;  %v952_v38 = vmul.f32 0.5, %v1306_v33  ;;  %v820_v39 = vadd.f32 %v819_v35, %v1536_v14  ;;  %v821_v40 = vpop.f32.mrb[14].mxu1 }
 0x1f2   : > { %v966_v41 = vsub.f32 %v951_v13, %v1560_v50  ;;  %v953_v42 = vmul.f32 0.5, %v1308_v36  ;;  %v938_v43 = vmul.f32 0.5, %v818_v34  ;;  %v822_v44 = vpop.f32.mrb[15].mxu1 }
 0x1f3   : > { %v1000_v45 = vmul.f32 %v1538_v17, %v965_v37  ;;  %v967_v47 = vsub.f32 %v952_v38, %v1564_v55  ;;  %v939_v48 = vmul.f32 0.5, %v820_v39 }
 0x1f4   : > { %v1001_v14 = vmul.f32 %v1538_v17, %v966_v41  ;;  %v968_v49 = vsub.f32 %v953_v42, %v1568_v59  ;;  %1317 = vtanh.f32 %v938_v43 }
 0x1f5   : > { %v1010_v51 = vadd.f32 %v1000_v45, %v1558_v46  ;;  %v1002_v52 = vmul.f32 %v1540_v18, %v967_v47  ;;  %1319 = vtanh.f32 %v939_v48 }
 0x1f6   : > { %v1310_v53 = vpop.eup %1309  ;;  %v1011_v54 = vadd.f32 %v1001_v14, %v1560_v50  ;;  %v1003_v56 = vmul.f32 %v1540_v18, %v968_v49 }
 0x1f7   : > { %v1312_v57 = vpop.eup %1311  ;;  %1020 = vst [vmem:[%s1602_s19] sm:$0xff] %v1010_v51  ;;  %v1012_v58 = vadd.f32 %v1002_v52, %v1564_v55  ;;  %v954_v17 = vmul.f32 0.5, %v1310_v53 }
 0x1f8   : > { %v1314_v60 = vpop.eup %1313  ;;  %1021 = vst [vmem:[%s1602_s19 + $0x8] sm:$0xff] %v1011_v54  ;;  %v1013_v61 = vadd.f32 %v1003_v56, %v1568_v59  ;;  %v955_v62 = vmul.f32 0.5, %v1312_v57 }
 0x1f9   : > { %v1316_v46 = vpop.eup %1315  ;;  %1022 = vst [vmem:[%s1602_s19 + $0x10] sm:$0xff] %v1012_v58  ;;  %v969_v63 = vsub.f32 %v954_v17, %v1577_v5  ;;  %v956_v1 = vmul.f32 0.5, %v1314_v60 }
 0x1fa   : > { %1023 = vst [vmem:[%s1602_s19 + $0x18] sm:$0xff] %v1013_v61  ;;  %v970_v18 = vsub.f32 %v955_v62, %v1580_v10  ;;  %v957_v50 = vmul.f32 0.5, %v1316_v46 }
 0x1fb   : > { %v1004_v2 = vmul.f32 %v1542_v0, %v969_v63  ;;  %v971_v55 = vsub.f32 %v956_v1, %v1584_v22 }
 0x1fc   : > { %v1005_v3 = vmul.f32 %v1542_v0, %v970_v18  ;;  %v972_v59 = vsub.f32 %v957_v50, %v1588_v26 }
 0x1fd   : > { %v1014_v4 = vadd.f32 %v1004_v2, %v1577_v5  ;;  %v1006_v6 = vmul.f32 %v1544_v19, %v971_v55 }
 0x1fe   : > { %v1318_v7 = vpop.eup %1317  ;;  %v1015_v8 = vadd.f32 %v1005_v3, %v1580_v10  ;;  %v1007_v9 = vmul.f32 %v1544_v19, %v972_v59 }
 0x1ff   : > { %v1320_v11 = vpop.eup %1319  ;;  %1024 = vst [vmem:[%s1602_s19 + $0x20] sm:$0xff] %v1014_v4  ;;  %v1016_v15 = vadd.f32 %v1006_v6, %v1584_v22  ;;  %v958_v16 = vmul.f32 0.5, %v1318_v7 }
 0x200   : > { %1025 = vst [vmem:[%s1602_s19 + $0x28] sm:$0xff] %v1015_v8  ;;  %v1017_v0 = vadd.f32 %v1007_v9, %v1588_v26  ;;  %v959_v21 = vmul.f32 0.5, %v1320_v11 }
 0x201   : > { %1026 = vst [vmem:[%s1602_s19 + $0x30] sm:$0xff] %v1016_v15  ;;  %v973_v5 = vsub.f32 %v958_v16, %v818_v34 }
 0x202   : > { %1027 = vst [vmem:[%s1602_s19 + $0x38] sm:$0xff] %v1017_v0  ;;  %v974_v23 = vsub.f32 %v959_v21, %v820_v39 }
 0x203   : > { %v1008_v24 = vmul.f32 %v1546_v20, %v973_v5 }
 0x204   : > { %v1009_v10 = vmul.f32 %v1546_v20, %v974_v23 }
 0x205   : > { %v1018_v19 = vadd.f32 %v1008_v24, %v818_v34 }
 0x206   : > { %v1019_v25 = vadd.f32 %v1009_v10, %v820_v39 }
 0x207   : > { %1028 = vst [vmem:[%s1602_s19 + $0x40] sm:$0xf] %v1018_v19 }
 0x208   : > { %1029 = vst [vmem:[%s1602_s19 + $0x48] sm:$0xf] %v1019_v25 }
 0x209 PF: > { %s23_s23 = sadd.s32 1, %s1343_s23   ;;  %s1658_s21 = smov %s1339_s22 }
 0x20a   : > { %p20_p5 = scmp.ge.s32.totalorder %s23_s23, 4   ;;  %s1659_s22 = smov %s1661_s24 }
 0x20c   :  { %22 = sbr.rel (!%p20_p5) target bundleno = 2 (0x2), region = 114 }

</bundles_post_ra>
